<compile_context>
chip_gen: v5e
topology: v5e:2x2
jax: 0.10.0
libtpu: 0.0.40
codegen_flags: <defaults>
</compile_context>

<pallas_src>
import functools

import jax
import jax.numpy as jnp
from jax.experimental import pallas as pl
from jax.experimental.pallas import tpu as pltpu


LANE = 128
SUBLANE = 8


def _round_up(n: int, m: int) -> int:
    return ((n + m - 1) // m) * m


# ----------------------------- fused Pallas kernel -----------------------------

def _actor_critic_kernel(
        x_ref, a_ref,
        pw1_ref, pb1_ref, pw2_ref, pb2_ref, pw3_ref, pb3_ref,
        qw1x_ref, qw1a_ref, qb1_ref, qw2_ref, qb2_ref, qw3_ref, qb3_ref,
        pi_ref, qq_ref, *, act_limit: float):
    """Fused forward on one batch tile: pi = policy(x); qq = [Q(x,a); Q(x,pi)]."""
    bf16 = jnp.bfloat16
    f32 = jnp.float32

    x = x_ref[...]            # (bt, in_p)  bf16
    a = a_ref[...]            # (bt, act_p) bf16

    # ---- policy head: relu -> relu -> tanh * act_limit (elementwise in f32) ----
    h = jnp.dot(x, pw1_ref[...], preferred_element_type=f32) + pb1_ref[...]
    h = jnp.maximum(h, 0.0)
    h = jnp.dot(h.astype(bf16), pw2_ref[...], preferred_element_type=f32) + pb2_ref[...]
    h = jnp.maximum(h, 0.0)
    pi = jnp.tanh(jnp.dot(h.astype(bf16), pw3_ref[...], preferred_element_type=f32)
                  + pb3_ref[...])
    if act_limit != 1.0:               # skip redundant VPU multiply when scale is 1
        pi = act_limit * pi
    pi_ref[...] = pi.astype(pi_ref.dtype)

    # ---- Q head (shared weights) on (x, a) and (x, pi), fused into one chain ----
    # x @ W1_x is identical for both evaluations -> compute once; stacking the two
    # action inputs along the batch axis amortizes the MXU weight pushes of
    # W1_a / W2 / W3 across a single M = 2*bt matmul chain.
    bt = x.shape[0]
    xh = jnp.dot(x, qw1x_ref[...], preferred_element_type=f32)           # (bt, h1_p)
    acts = jnp.concatenate([a, pi.astype(bf16)], axis=0)                 # (2bt, act_p)
    hq = (jnp.concatenate([xh, xh], axis=0)
          + jnp.dot(acts, qw1a_ref[...], preferred_element_type=f32)
          + qb1_ref[...])
    hq = jnp.maximum(hq, 0.0)
    hq = jnp.dot(hq.astype(bf16), qw2_ref[...], preferred_element_type=f32) + qb2_ref[...]
    hq = jnp.maximum(hq, 0.0)
    qq = jnp.dot(hq.astype(bf16), qw3_ref[...], preferred_element_type=f32) + qb3_ref[...]
    qq_ref[0] = qq[:bt].astype(qq_ref.dtype)      # q(x, a)
    qq_ref[1] = qq[bt:].astype(qq_ref.dtype)      # q(x, pi)


# ----------------------------- wrapper helpers -----------------------------

def _pad2(arr, rows, cols, dtype):
    r, c = arr.shape
    return jnp.pad(arr, ((0, rows - r), (0, cols - c))).astype(dtype)


def _choose_tiling(batch: int, cap: int = 1024):
    """Pick (batch_tile, n_tiles).  Guarantees an even number of grid steps whenever
    batch > 8 so a "parallel" grid axis keeps both v7x TensorCores busy; caps the
    tile at 1024 rows (weights are VMEM-resident so bigger tiles only add
    activation traffic)."""
    if batch <= SUBLANE:
        return SUBLANE, 1
    n_tiles = max(2, -(-batch // cap))
    if n_tiles % 2:
        n_tiles += 1
    bt = _round_up(-(-batch // n_tiles), SUBLANE)
    return bt, n_tiles


def _vmem_limit_bytes(bt, in_p, act_p, h1_p, h2_p, q_p, weight_bytes):
    """Explicit VMEM budget: weights (1 buffer each) + double-buffered I/O tiles +
    live f32 temporaries, with 1.5x headroom. Clamped to [32 MiB, 64 MiB] so it is
    safe on v7x (64 MiB/TC) while letting v5e/v6e use large tiles."""
    act_in = 2 * bt * (in_p + act_p) * 2                       # x, a (bf16, 2 bufs)
    outs = 2 * (bt * act_p + 2 * bt * q_p) * 4                 # pi, qq (f32, 2 bufs)
    temps = (bt * (2 * h1_p + h2_p)                            # h, xh, h2
             + 2 * bt * (act_p + h1_p + h2_p + q_p)) * 4       # fused-Q temporaries
    need = weight_bytes + act_in + outs + temps
    return int(min(max(int(need * 1.5) + (4 << 20), 32 << 20), 64 << 20))


# ----------------------------- wrapper -----------------------------

def actor_critic_forward(params, x, a, act_limit):
    """Returns (pi, q(x,a), q(x,pi)) matching the PyTorch ActorCritic semantics."""
    batch, in_features = x.shape
    act_dim = a.shape[1]

    pw1, pb1, pw2, pb2, pw3, pb3 = params["policy"]
    qw1, qb1, qw2, qb2, qw3, qb3 = params["q"]
    h1 = pw1.shape[1]
    h2 = pw2.shape[1]

    # Padded geometry: lane-dense feature axes, sublane-aligned batch tiles.
    in_p = _round_up(in_features, LANE)
    act_p = _round_up(act_dim, LANE)
    h1_p = _round_up(h1, LANE)
    h2_p = _round_up(h2, LANE)
    q_p = LANE                            # scalar q head padded 1 -> 128 lanes
    bt, n_tiles = _choose_tiling(batch)
    b_p = bt * n_tiles

    bf16, f32 = jnp.bfloat16, jnp.float32

    # Zero-padded activations (padding rows/lanes are inert). bf16 halves DMA;
    # they are only ever matmul operands inside the kernel.
    xp = _pad2(x.astype(f32), b_p, in_p, bf16)
    ap = _pad2(a.astype(f32), b_p, act_p, bf16)

    # Zero-padded weights in bf16 (MXU operands); biases stay f32 (added post-dot).
    # q's first layer is split into x-part / action-part so the kernel never needs
    # a concatenated [x, a] feature axis.
    pw1p, pb1p = _pad2(pw1, in_p, h1_p, bf16), _pad2(pb1, 1, h1_p, f32)
    pw2p, pb2p = _pad2(pw2, h1_p, h2_p, bf16), _pad2(pb2, 1, h2_p, f32)
    pw3p, pb3p = _pad2(pw3, h2_p, act_p, bf16), _pad2(pb3, 1, act_p, f32)
    qw1xp = _pad2(qw1[:in_features, :], in_p, h1_p, bf16)
    qw1ap = _pad2(qw1[in_features:, :], act_p, h1_p, bf16)
    qb1p = _pad2(qb1, 1, h1_p, f32)
    qw2p, qb2p = _pad2(qw2, h1_p, h2_p, bf16), _pad2(qb2, 1, h2_p, f32)
    qw3p, qb3p = _pad2(qw3, h2_p, q_p, bf16), _pad2(qb3, 1, q_p, f32)

    weights = (pw1p, pb1p, pw2p, pb2p, pw3p, pb3p,
               qw1xp, qw1ap, qb1p, qw2p, qb2p, qw3p, qb3p)
    weight_bytes = sum(w.size * w.dtype.itemsize for w in weights)

    def resident(w):
        # Full-array block, same block every grid step, single VMEM buffer.
        return pl.BlockSpec(w.shape, lambda i: (0, 0), pipeline_mode=pl.Buffered(1))

    grid = (n_tiles,)
    in_specs = ([pl.BlockSpec((bt, in_p), lambda i: (i, 0)),
                 pl.BlockSpec((bt, act_p), lambda i: (i, 0))]
                + [resident(w) for w in weights])
    # q(x,a) and q(x,pi) are merged into one (2, B, 128) output array.
    out_specs = (pl.BlockSpec((bt, act_p), lambda i: (i, 0)),
                 pl.BlockSpec((2, bt, q_p), lambda i: (0, i, 0)))
    out_shape = (jax.ShapeDtypeStruct((b_p, act_p), f32),
                 jax.ShapeDtypeStruct((2, b_p, q_p), f32))

    kernel = functools.partial(_actor_critic_kernel, act_limit=float(act_limit))
    pi_pad, qq_pad = pl.pallas_call(
        kernel,
        grid=grid,
        in_specs=in_specs,
        out_specs=out_specs,
        out_shape=out_shape,
        compiler_params=pltpu.CompilerParams(
            dimension_semantics=("parallel",),   # >=2 grid steps => both v7x TCs work
            vmem_limit_bytes=_vmem_limit_bytes(bt, in_p, act_p, h1_p, h2_p, q_p,
                                               weight_bytes)),
    )(xp, ap, *weights)

    pi = pi_pad[:batch, :act_dim]
    # torch's .squeeze() on (B, 1) -> (B,); explicit column slice keeps a 1-D
    # array even when batch == 1.
    q = qq_pad[0, :batch, 0]
    q_pi = qq_pad[1, :batch, 0]
    return pi, q, q_pi


# ----------------------------- parameter setup -----------------------------

def _linear_params(key, fan_in, fan_out):
    """Init mimicking torch.nn.Linear default (uniform +-1/sqrt(fan_in))."""
    kw, kb = jax.random.split(key)
    bound = 1.0 / jnp.sqrt(jnp.float32(fan_in))
    # Stored as [in, out] so the kernel computes x @ W directly.
    w = jax.random.uniform(kw, (fan_in, fan_out), jnp.float32, -bound, bound)
    b = jax.random.uniform(kb, (1, fan_out), jnp.float32, -bound, bound)
    return w, b


def make_actor_critic_params(key, in_features, hidden_sizes, act_dim):
    h1, h2 = hidden_sizes
    keys = jax.random.split(key, 6)
    # policy: in -> h1 -> h2 -> act_dim
    pw1, pb1 = _linear_params(keys[0], in_features, h1)
    pw2, pb2 = _linear_params(keys[1], h1, h2)
    pw3, pb3 = _linear_params(keys[2], h2, act_dim)
    # q: in + act_dim -> h1 -> h2 -> 1
    qw1, qb1 = _linear_params(keys[3], in_features + act_dim, h1)
    qw2, qb2 = _linear_params(keys[4], h1, h2)
    qw3, qb3 = _linear_params(keys[5], h2, 1)
    return {
        "policy": (pw1, pb1, pw2, pb2, pw3, pb3),
        "q": (qw1, qb1, qw2, qb2, qw3, qb3),
    }


# ----------------------------- pure-JAX reference -----------------------------

def _ref_forward(params, x, a, act_limit):
    def mlp(p, inp, tanh_out, scale):
        w1, b1, w2, b2, w3, b3 = p
        h = jnp.maximum(inp @ w1 + b1, 0.0)
        h = jnp.maximum(h @ w2 + b2, 0.0)
        o = h @ w3 + b3
        if tanh_out:
            o = jnp.tanh(o)
        return scale * o
    pi = mlp(params["policy"], x, True, act_limit)
    q = mlp(params["q"], jnp.concatenate([x, a], axis=1), False, 1.0)[:, 0]
    q_pi = mlp(params["q"], jnp.concatenate([x, pi], axis=1), False, 1.0)[:, 0]
    return pi, q, q_pi


# ----------------------------- main -----------------------------

if __name__ == "__main__":
    in_features = 16
    act_dim = 4
    hidden_sizes = (32, 32)   # small stand-in for the default (400, 300)
    act_limit = 2.0           # action_space.high[0]

    key = jax.random.PRNGKey(0)
    kp = jax.random.fold_in(key, 1)
    params = make_actor_critic_params(kp, in_features, hidden_sizes, act_dim)

    fwd = jax.jit(functools.partial(actor_critic_forward, act_limit=act_limit))

    # batch=8 exercises the single-tile path, batch=20 the multi-tile (padded,
    # 2 grid steps) path.
    for batch in (8, 20):
        kb = jax.random.fold_in(key, 100 + batch)
        kx, ka = jax.random.split(kb)
        x = jax.random.normal(kx, (batch, in_features), jnp.float32)
        a = jax.random.uniform(ka, (batch, act_dim), jnp.float32, -act_limit, act_limit)

        pi, q, q_pi = fwd(params, x, a)
        jax.block_until_ready((pi, q, q_pi))

        assert pi.shape == (batch, act_dim)
        assert q.shape == (batch,)
        assert q_pi.shape == (batch,)
        assert bool(jnp.all(jnp.abs(pi) <= act_limit + 1e-5))

        # bf16 matmul operands (f32 accumulation) vs f32 XLA reference: a few-percent
        # tolerance is expected; with f32 operands ~1e-5 would suffice.
        pi_r, q_r, qpi_r = _ref_forward(params, x, a, act_limit)
        assert bool(jnp.allclose(pi, pi_r, rtol=3e-2, atol=3e-2))
        assert bool(jnp.allclose(q, q_r, rtol=3e-2, atol=3e-2))
        assert bool(jnp.allclose(q_pi, qpi_r, rtol=3e-2, atol=3e-2))

    print("KERNEL_OK")
</pallas_src>

<mosaic_0001>
module attributes {stable_mosaic.version = 11 : i64} {
  func.func @_actor_critic_kernel(%arg0: i32, %arg1: memref<8x128xbf16, #tpu.memory_space<vmem>>, %arg2: memref<8x128xbf16, #tpu.memory_space<vmem>>, %arg3: memref<128x128xbf16, #tpu.memory_space<vmem>>, %arg4: memref<1x128xf32, #tpu.memory_space<vmem>>, %arg5: memref<128x128xbf16, #tpu.memory_space<vmem>>, %arg6: memref<1x128xf32, #tpu.memory_space<vmem>>, %arg7: memref<128x128xbf16, #tpu.memory_space<vmem>>, %arg8: memref<1x128xf32, #tpu.memory_space<vmem>>, %arg9: memref<128x128xbf16, #tpu.memory_space<vmem>>, %arg10: memref<128x128xbf16, #tpu.memory_space<vmem>>, %arg11: memref<1x128xf32, #tpu.memory_space<vmem>>, %arg12: memref<128x128xbf16, #tpu.memory_space<vmem>>, %arg13: memref<1x128xf32, #tpu.memory_space<vmem>>, %arg14: memref<128x128xbf16, #tpu.memory_space<vmem>>, %arg15: memref<1x128xf32, #tpu.memory_space<vmem>>, %arg16: memref<8x128xf32, #tpu.memory_space<vmem>>, %arg17: memref<2x8x128xf32, #tpu.memory_space<vmem>>) attributes {dimension_semantics = [#tpu.dimension_semantics<parallel>], iteration_bounds = array<i64: 1>, scalar_prefetch = 0 : i64, scratch_operands = 0 : i64, tpu.core_type = #tpu.core_type<tc>, window_params = [{transform_indices = @transform_0, window_bounds = array<i64: 8, 128>}, {transform_indices = @transform_1, window_bounds = array<i64: 8, 128>}, {pipeline_mode = #tpu.pipeline_mode<synchronous>, transform_indices = @transform_2, window_bounds = array<i64: 128, 128>}, {pipeline_mode = #tpu.pipeline_mode<synchronous>, transform_indices = @transform_3, window_bounds = array<i64: 1, 128>}, {pipeline_mode = #tpu.pipeline_mode<synchronous>, transform_indices = @transform_4, window_bounds = array<i64: 128, 128>}, {pipeline_mode = #tpu.pipeline_mode<synchronous>, transform_indices = @transform_5, window_bounds = array<i64: 1, 128>}, {pipeline_mode = #tpu.pipeline_mode<synchronous>, transform_indices = @transform_6, window_bounds = array<i64: 128, 128>}, {pipeline_mode = #tpu.pipeline_mode<synchronous>, transform_indices = @transform_7, window_bounds = array<i64: 1, 128>}, {pipeline_mode = #tpu.pipeline_mode<synchronous>, transform_indices = @transform_8, window_bounds = array<i64: 128, 128>}, {pipeline_mode = #tpu.pipeline_mode<synchronous>, transform_indices = @transform_9, window_bounds = array<i64: 128, 128>}, {pipeline_mode = #tpu.pipeline_mode<synchronous>, transform_indices = @transform_10, window_bounds = array<i64: 1, 128>}, {pipeline_mode = #tpu.pipeline_mode<synchronous>, transform_indices = @transform_11, window_bounds = array<i64: 128, 128>}, {pipeline_mode = #tpu.pipeline_mode<synchronous>, transform_indices = @transform_12, window_bounds = array<i64: 1, 128>}, {pipeline_mode = #tpu.pipeline_mode<synchronous>, transform_indices = @transform_13, window_bounds = array<i64: 128, 128>}, {pipeline_mode = #tpu.pipeline_mode<synchronous>, transform_indices = @transform_14, window_bounds = array<i64: 1, 128>}, {transform_indices = @transform_15, window_bounds = array<i64: 8, 128>}, {transform_indices = @transform_16, window_bounds = array<i64: 2, 8, 128>}]} {
    %c0 = arith.constant 0 : index
    %c0_0 = arith.constant 0 : index
    %0 = vector.load %arg1[%c0, %c0_0] : memref<8x128xbf16, #tpu.memory_space<vmem>>, vector<8x128xbf16>
    %c0_1 = arith.constant 0 : index
    %c0_2 = arith.constant 0 : index
    %1 = vector.load %arg2[%c0_1, %c0_2] : memref<8x128xbf16, #tpu.memory_space<vmem>>, vector<8x128xbf16>
    %c0_3 = arith.constant 0 : index
    %c0_4 = arith.constant 0 : index
    %2 = vector.load %arg3[%c0_3, %c0_4] : memref<128x128xbf16, #tpu.memory_space<vmem>>, vector<128x128xbf16>
    %cst = arith.constant dense<0.000000e+00> : vector<8x128xf32>
    %3 = tpu.matmul %0, %2, %cst {dimension_numbers = #tpu.dot_dimension_numbers<[1], [0], [0], [1], [0, 0, 1, 1], [], []>} : vector<8x128xbf16>, vector<128x128xbf16>, vector<8x128xf32> -> vector<8x128xf32>
    %c0_5 = arith.constant 0 : index
    %c0_6 = arith.constant 0 : index
    %4 = vector.load %arg4[%c0_5, %c0_6] : memref<1x128xf32, #tpu.memory_space<vmem>>, vector<1x128xf32>
    %5 = vector.broadcast %4 : vector<1x128xf32> to vector<8x128xf32>
    %6 = arith.addf %3, %5 : vector<8x128xf32>
    %cst_7 = arith.constant 0.000000e+00 : f32
    %7 = vector.broadcast %cst_7 : f32 to vector<8x128xf32>
    %8 = arith.maximumf %6, %7 : vector<8x128xf32>
    %9 = arith.truncf %8 : vector<8x128xf32> to vector<8x128xbf16>
    %c0_8 = arith.constant 0 : index
    %c0_9 = arith.constant 0 : index
    %10 = vector.load %arg5[%c0_8, %c0_9] : memref<128x128xbf16, #tpu.memory_space<vmem>>, vector<128x128xbf16>
    %cst_10 = arith.constant dense<0.000000e+00> : vector<8x128xf32>
    %11 = tpu.matmul %9, %10, %cst_10 {dimension_numbers = #tpu.dot_dimension_numbers<[1], [0], [0], [1], [0, 0, 1, 1], [], []>} : vector<8x128xbf16>, vector<128x128xbf16>, vector<8x128xf32> -> vector<8x128xf32>
    %c0_11 = arith.constant 0 : index
    %c0_12 = arith.constant 0 : index
    %12 = vector.load %arg6[%c0_11, %c0_12] : memref<1x128xf32, #tpu.memory_space<vmem>>, vector<1x128xf32>
    %13 = vector.broadcast %12 : vector<1x128xf32> to vector<8x128xf32>
    %14 = arith.addf %11, %13 : vector<8x128xf32>
    %cst_13 = arith.constant 0.000000e+00 : f32
    %15 = vector.broadcast %cst_13 : f32 to vector<8x128xf32>
    %16 = arith.maximumf %14, %15 : vector<8x128xf32>
    %17 = arith.truncf %16 : vector<8x128xf32> to vector<8x128xbf16>
    %c0_14 = arith.constant 0 : index
    %c0_15 = arith.constant 0 : index
    %18 = vector.load %arg7[%c0_14, %c0_15] : memref<128x128xbf16, #tpu.memory_space<vmem>>, vector<128x128xbf16>
    %cst_16 = arith.constant dense<0.000000e+00> : vector<8x128xf32>
    %19 = tpu.matmul %17, %18, %cst_16 {dimension_numbers = #tpu.dot_dimension_numbers<[1], [0], [0], [1], [0, 0, 1, 1], [], []>} : vector<8x128xbf16>, vector<128x128xbf16>, vector<8x128xf32> -> vector<8x128xf32>
    %c0_17 = arith.constant 0 : index
    %c0_18 = arith.constant 0 : index
    %20 = vector.load %arg8[%c0_17, %c0_18] : memref<1x128xf32, #tpu.memory_space<vmem>>, vector<1x128xf32>
    %21 = vector.broadcast %20 : vector<1x128xf32> to vector<8x128xf32>
    %22 = arith.addf %19, %21 : vector<8x128xf32>
    %23 = math.tanh %22 : vector<8x128xf32>
    %cst_19 = arith.constant 2.000000e+00 : f32
    %24 = vector.broadcast %cst_19 : f32 to vector<8x128xf32>
    %25 = arith.mulf %24, %23 : vector<8x128xf32>
    %c0_20 = arith.constant 0 : index
    %c0_21 = arith.constant 0 : index
    %26 = vector.load %arg16[%c0_20, %c0_21] : memref<8x128xf32, #tpu.memory_space<vmem>>, vector<8x128xf32>
    tpu.vector_store %arg16[%c0_20, %c0_21], %25 {strides = array<i32>} : memref<8x128xf32, #tpu.memory_space<vmem>>, vector<8x128xf32>,
    %c0_22 = arith.constant 0 : index
    %c0_23 = arith.constant 0 : index
    %27 = vector.load %arg9[%c0_22, %c0_23] : memref<128x128xbf16, #tpu.memory_space<vmem>>, vector<128x128xbf16>
    %cst_24 = arith.constant dense<0.000000e+00> : vector<8x128xf32>
    %28 = tpu.matmul %0, %27, %cst_24 {dimension_numbers = #tpu.dot_dimension_numbers<[1], [0], [0], [1], [0, 0, 1, 1], [], []>} : vector<8x128xbf16>, vector<128x128xbf16>, vector<8x128xf32> -> vector<8x128xf32>
    %29 = arith.truncf %25 : vector<8x128xf32> to vector<8x128xbf16>
    %30 = tpu.concatenate %1, %29 in 0 : vector<8x128xbf16>, vector<8x128xbf16> -> vector<16x128xbf16>
    %31 = tpu.concatenate %28, %28 in 0 : vector<8x128xf32>, vector<8x128xf32> -> vector<16x128xf32>
    %c0_25 = arith.constant 0 : index
    %c0_26 = arith.constant 0 : index
    %32 = vector.load %arg10[%c0_25, %c0_26] : memref<128x128xbf16, #tpu.memory_space<vmem>>, vector<128x128xbf16>
    %cst_27 = arith.constant dense<0.000000e+00> : vector<16x128xf32>
    %33 = tpu.matmul %30, %32, %cst_27 {dimension_numbers = #tpu.dot_dimension_numbers<[1], [0], [0], [1], [0, 0, 1, 1], [], []>} : vector<16x128xbf16>, vector<128x128xbf16>, vector<16x128xf32> -> vector<16x128xf32>
    %34 = arith.addf %31, %33 : vector<16x128xf32>
    %c0_28 = arith.constant 0 : index
    %c0_29 = arith.constant 0 : index
    %35 = vector.load %arg11[%c0_28, %c0_29] : memref<1x128xf32, #tpu.memory_space<vmem>>, vector<1x128xf32>
    %36 = vector.broadcast %35 : vector<1x128xf32> to vector<16x128xf32>
    %37 = arith.addf %34, %36 : vector<16x128xf32>
    %cst_30 = arith.constant 0.000000e+00 : f32
    %38 = vector.broadcast %cst_30 : f32 to vector<16x128xf32>
    %39 = arith.maximumf %37, %38 : vector<16x128xf32>
    %40 = arith.truncf %39 : vector<16x128xf32> to vector<16x128xbf16>
    %c0_31 = arith.constant 0 : index
    %c0_32 = arith.constant 0 : index
    %41 = vector.load %arg12[%c0_31, %c0_32] : memref<128x128xbf16, #tpu.memory_space<vmem>>, vector<128x128xbf16>
    %cst_33 = arith.constant dense<0.000000e+00> : vector<16x128xf32>
    %42 = tpu.matmul %40, %41, %cst_33 {dimension_numbers = #tpu.dot_dimension_numbers<[1], [0], [0], [1], [0, 0, 1, 1], [], []>} : vector<16x128xbf16>, vector<128x128xbf16>, vector<16x128xf32> -> vector<16x128xf32>
    %c0_34 = arith.constant 0 : index
    %c0_35 = arith.constant 0 : index
    %43 = vector.load %arg13[%c0_34, %c0_35] : memref<1x128xf32, #tpu.memory_space<vmem>>, vector<1x128xf32>
    %44 = vector.broadcast %43 : vector<1x128xf32> to vector<16x128xf32>
    %45 = arith.addf %42, %44 : vector<16x128xf32>
    %cst_36 = arith.constant 0.000000e+00 : f32
    %46 = vector.broadcast %cst_36 : f32 to vector<16x128xf32>
    %47 = arith.maximumf %45, %46 : vector<16x128xf32>
    %48 = arith.truncf %47 : vector<16x128xf32> to vector<16x128xbf16>
    %c0_37 = arith.constant 0 : index
    %c0_38 = arith.constant 0 : index
    %49 = vector.load %arg14[%c0_37, %c0_38] : memref<128x128xbf16, #tpu.memory_space<vmem>>, vector<128x128xbf16>
    %cst_39 = arith.constant dense<0.000000e+00> : vector<16x128xf32>
    %50 = tpu.matmul %48, %49, %cst_39 {dimension_numbers = #tpu.dot_dimension_numbers<[1], [0], [0], [1], [0, 0, 1, 1], [], []>} : vector<16x128xbf16>, vector<128x128xbf16>, vector<16x128xf32> -> vector<16x128xf32>
    %c0_40 = arith.constant 0 : index
    %c0_41 = arith.constant 0 : index
    %51 = vector.load %arg15[%c0_40, %c0_41] : memref<1x128xf32, #tpu.memory_space<vmem>>, vector<1x128xf32>
    %52 = vector.broadcast %51 : vector<1x128xf32> to vector<16x128xf32>
    %53 = arith.addf %50, %52 : vector<16x128xf32>
    %54 = vector.extract_strided_slice %53 {offsets = [0, 0], sizes = [8, 128], strides = [1, 1]} : vector<16x128xf32> to vector<8x128xf32>
    %c0_42 = arith.constant 0 : index
    %c0_43 = arith.constant 0 : index
    %c0_44 = arith.constant 0 : index
    %55 = vector.load %arg17[%c0_42, %c0_43, %c0_44] : memref<2x8x128xf32, #tpu.memory_space<vmem>>, vector<1x8x128xf32>
    %56 = vector.shape_cast %55 : vector<1x8x128xf32> to vector<8x128xf32>
    %57 = vector.shape_cast %54 : vector<8x128xf32> to vector<1x8x128xf32>
    tpu.vector_store %arg17[%c0_42, %c0_43, %c0_44], %57 {strides = array<i32>} : memref<2x8x128xf32, #tpu.memory_space<vmem>>, vector<1x8x128xf32>,
    %58 = vector.extract_strided_slice %53 {offsets = [8, 0], sizes = [8, 128], strides = [1, 1]} : vector<16x128xf32> to vector<8x128xf32>
    %c1 = arith.constant 1 : index
    %c0_45 = arith.constant 0 : index
    %c0_46 = arith.constant 0 : index
    %59 = vector.load %arg17[%c1, %c0_45, %c0_46] : memref<2x8x128xf32, #tpu.memory_space<vmem>>, vector<1x8x128xf32>
    %60 = vector.shape_cast %59 : vector<1x8x128xf32> to vector<8x128xf32>
    %61 = vector.shape_cast %58 : vector<8x128xf32> to vector<1x8x128xf32>
    tpu.vector_store %arg17[%c1, %c0_45, %c0_46], %61 {strides = array<i32>} : memref<2x8x128xf32, #tpu.memory_space<vmem>>, vector<1x8x128xf32>,
    return
  }
  func.func @transform_0(%arg0: i32) -> (i32, i32) {
    %c0_i32 = arith.constant 0 : i32
    %c0_i32_0 = arith.constant 0 : i32
    return %arg0, %c0_i32 : i32, i32
  }
  func.func @transform_1(%arg0: i32) -> (i32, i32) {
    %c0_i32 = arith.constant 0 : i32
    %c0_i32_0 = arith.constant 0 : i32
    return %arg0, %c0_i32 : i32, i32
  }
  func.func @transform_2(%arg0: i32) -> (i32, i32) {
    %c0_i32 = arith.constant 0 : i32
    %c0_i32_0 = arith.constant 0 : i32
    %c0_i32_1 = arith.constant 0 : i32
    return %c0_i32, %c0_i32_0 : i32, i32
  }
  func.func @transform_3(%arg0: i32) -> (i32, i32) {
    %c0_i32 = arith.constant 0 : i32
    %c0_i32_0 = arith.constant 0 : i32
    %c0_i32_1 = arith.constant 0 : i32
    return %c0_i32, %c0_i32_0 : i32, i32
  }
  func.func @transform_4(%arg0: i32) -> (i32, i32) {
    %c0_i32 = arith.constant 0 : i32
    %c0_i32_0 = arith.constant 0 : i32
    %c0_i32_1 = arith.constant 0 : i32
    return %c0_i32, %c0_i32_0 : i32, i32
  }
  func.func @transform_5(%arg0: i32) -> (i32, i32) {
    %c0_i32 = arith.constant 0 : i32
    %c0_i32_0 = arith.constant 0 : i32
    %c0_i32_1 = arith.constant 0 : i32
    return %c0_i32, %c0_i32_0 : i32, i32
  }
  func.func @transform_6(%arg0: i32) -> (i32, i32) {
    %c0_i32 = arith.constant 0 : i32
    %c0_i32_0 = arith.constant 0 : i32
    %c0_i32_1 = arith.constant 0 : i32
    return %c0_i32, %c0_i32_0 : i32, i32
  }
  func.func @transform_7(%arg0: i32) -> (i32, i32) {
    %c0_i32 = arith.constant 0 : i32
    %c0_i32_0 = arith.constant 0 : i32
    %c0_i32_1 = arith.constant 0 : i32
    return %c0_i32, %c0_i32_0 : i32, i32
  }
  func.func @transform_8(%arg0: i32) -> (i32, i32) {
    %c0_i32 = arith.constant 0 : i32
    %c0_i32_0 = arith.constant 0 : i32
    %c0_i32_1 = arith.constant 0 : i32
    return %c0_i32, %c0_i32_0 : i32, i32
  }
  func.func @transform_9(%arg0: i32) -> (i32, i32) {
    %c0_i32 = arith.constant 0 : i32
    %c0_i32_0 = arith.constant 0 : i32
    %c0_i32_1 = arith.constant 0 : i32
    return %c0_i32, %c0_i32_0 : i32, i32
  }
  func.func @transform_10(%arg0: i32) -> (i32, i32) {
    %c0_i32 = arith.constant 0 : i32
    %c0_i32_0 = arith.constant 0 : i32
    %c0_i32_1 = arith.constant 0 : i32
    return %c0_i32, %c0_i32_0 : i32, i32
  }
  func.func @transform_11(%arg0: i32) -> (i32, i32) {
    %c0_i32 = arith.constant 0 : i32
    %c0_i32_0 = arith.constant 0 : i32
    %c0_i32_1 = arith.constant 0 : i32
    return %c0_i32, %c0_i32_0 : i32, i32
  }
  func.func @transform_12(%arg0: i32) -> (i32, i32) {
    %c0_i32 = arith.constant 0 : i32
    %c0_i32_0 = arith.constant 0 : i32
    %c0_i32_1 = arith.constant 0 : i32
    return %c0_i32, %c0_i32_0 : i32, i32
  }
  func.func @transform_13(%arg0: i32) -> (i32, i32) {
    %c0_i32 = arith.constant 0 : i32
    %c0_i32_0 = arith.constant 0 : i32
    %c0_i32_1 = arith.constant 0 : i32
    return %c0_i32, %c0_i32_0 : i32, i32
  }
  func.func @transform_14(%arg0: i32) -> (i32, i32) {
    %c0_i32 = arith.constant 0 : i32
    %c0_i32_0 = arith.constant 0 : i32
    %c0_i32_1 = arith.constant 0 : i32
    return %c0_i32, %c0_i32_0 : i32, i32
  }
  func.func @transform_15(%arg0: i32) -> (i32, i32) {
    %c0_i32 = arith.constant 0 : i32
    %c0_i32_0 = arith.constant 0 : i32
    return %arg0, %c0_i32 : i32, i32
  }
  func.func @transform_16(%arg0: i32) -> (i32, i32, i32) {
    %c0_i32 = arith.constant 0 : i32
    %c0_i32_0 = arith.constant 0 : i32
    %c0_i32_1 = arith.constant 0 : i32
    return %c0_i32, %arg0, %c0_i32_0 : i32, i32, i32
  }
}

</mosaic_0001>

<bundles_post_ra>
// kernel: actor_critic_forward.1
= control target key start
LH: loop header
LB: loop body
LE: loop exit
PB: predicated region body
PF: predicated region fallthrough
CT: control target
= control target key end

     0   :  { %vm385_vm0 = vcmask 1043456   ;;  %s1236_s2 = inlined_call_operand.vmem [shape: bf16[128,128], index: 2, kind: input, shape index: {}]   ;;  %s1237_s4 = inlined_call_operand.vmem [shape: bf16[128,128], index: 4, kind: input, shape index: {}]   ;;  %s1238_s3 = inlined_call_operand.vmem [shape: f32[1,128], index: 3, kind: input, shape index: {}]   ;;  %s1239_s0 = inlined_call_operand.vmem [shape: bf16[8,128], index: 0, kind: input, shape index: {}]   ;;  %s1240_s5 = inlined_call_operand.vmem [shape: f32[1,128], index: 5, kind: input, shape index: {}]   ;;  %s1241_s6 = inlined_call_operand.vmem [shape: bf16[128,128], index: 6, kind: input, shape index: {}]   ;;  %s1242_s7 = inlined_call_operand.vmem [shape: f32[1,128], index: 7, kind: input, shape index: {}]   ;;  %s1243_s8 = inlined_call_operand.vmem [shape: bf16[128,128], index: 8, kind: input, shape index: {}]   ;;  %s1244_s9 = inlined_call_operand.vmem [shape: bf16[128,128], index: 9, kind: input, shape index: {}]   ;;  %s1245_s11 = inlined_call_operand.vmem [shape: bf16[128,128], index: 11, kind: input, shape index: {}]   ;;  %s1246_s10 = inlined_call_operand.vmem [shape: f32[1,128], index: 10, kind: input, shape index: {}]   ;;  %s1247_s15 = inlined_call_operand.vmem [shape: f32[8,128], index: 15, kind: output, shape index: {0}]   ;;  %s1248_s1 = inlined_call_operand.vmem [shape: bf16[8,128], index: 1, kind: input, shape index: {}]   ;;  %s1249_s12 = inlined_call_operand.vmem [shape: f32[1,128], index: 12, kind: input, shape index: {}]   ;;  %s1250_s13 = inlined_call_operand.vmem [shape: bf16[128,128], index: 13, kind: input, shape index: {}]   ;;  %s1251_s14 = inlined_call_operand.vmem [shape: f32[1,128], index: 14, kind: input, shape index: {}]   ;;  %s1252_s16 = inlined_call_operand.vmem [shape: f32[2,8,128], index: 16, kind: output, shape index: {1}]  }
   0x1   :  { %1254 = sst [smem:[#allocation2_spill]] %s1236_s2  ;;  %v897_v2 = vld [vmem:[%s1237_s4 + $0x38] sm:$0xff]  ;;  %v896_v3 = vld [vmem:[%s1237_s4 + $0x30] sm:$0xff]  ;;  %v895_v5 = vld [vmem:[%s1237_s4 + $0x28] sm:$0xff] }
   0x2   :  { %s1255_s23 = sld [smem:[#allocation2_spill]]  ;;  %205 = vmatpush.bf16.msra.mxu1 %v897_v2  ;;  %v894_v7 = vld [vmem:[%s1237_s4 + $0x20] sm:$0xff]  ;;  %v893_v9 = vld [vmem:[%s1237_s4 + $0x18] sm:$0xff]  ;;  %v892_v11 = vld [vmem:[%s1237_s4 + $0x10] sm:$0xff] }
   0x3   :  { %v1076_v14 = vld [vmem:[%s1239_s0] sm:$0xf]  ;;  %v891_v15 = vld [vmem:[%s1237_s4 + $0x8] sm:$0xff]  ;;  %v905_v17 = vld [vmem:[%s1241_s6 + $0x38] sm:$0xff] }
   0x4   :  { %v890_v16 = vld [vmem:[%s1237_s4] sm:$0xff]  ;;  %288 = vmatpush.bf16.msra.mxu2 %v905_v17  ;;  %v904_v18 = vld [vmem:[%s1241_s6 + $0x30] sm:$0xff]  ;;  %v903_v19 = vld [vmem:[%s1241_s6 + $0x28] sm:$0xff] }
   0x5   :  { %v902_v20 = vld [vmem:[%s1241_s6 + $0x20] sm:$0xff]  ;;  %v901_v21 = vld [vmem:[%s1241_s6 + $0x18] sm:$0xff]  ;;  %v900_v22 = vld [vmem:[%s1241_s6 + $0x10] sm:$0xff] }
   0x6   :  { %206 = vmatpush.bf16.msra.mxu1 %v896_v3  ;;  %v938_v23 = vld [vmem:[%s1238_s3] ss:$0 sm:$0xff]  ;;  %v899_v29 = vld [vmem:[%s1241_s6 + $0x8] sm:$0xff]  ;;  %v913_v31 = vld [vmem:[%s1243_s8 + $0x38] sm:$0xff] }
   0x7   :  { %v898_v30 = vld [vmem:[%s1241_s6] sm:$0xff]  ;;  %v921_v32 = vld [vmem:[%s1244_s9 + $0x38] sm:$0xff]  ;;  %368 = vmatpush.bf16.msra.mxu3 %v913_v31  ;;  %v912_v33 = vld [vmem:[%s1243_s8 + $0x30] sm:$0xff] }
   0x8   :  { %v889_v0 = vld [vmem:[%s1255_s23 + $0x38] sm:$0xff]  ;;  %v888_v1 = vld [vmem:[%s1255_s23 + $0x30] sm:$0xff]  ;;  %v887_v4 = vld [vmem:[%s1255_s23 + $0x28] sm:$0xff]  ;;  %289 = vmatpush.bf16.msra.mxu2 %v904_v18 }
   0x9   :  { %122 = vmatpush.bf16.msra.mxu0 %v889_v0  ;;  %v886_v6 = vld [vmem:[%s1255_s23 + $0x20] sm:$0xff]  ;;  %v885_v8 = vld [vmem:[%s1255_s23 + $0x18] sm:$0xff]  ;;  %v884_v10 = vld [vmem:[%s1255_s23 + $0x10] sm:$0xff] }
   0xa   :  { %207 = vmatpush.bf16.msra.mxu1 %v895_v5  ;;  %v883_v12 = vld [vmem:[%s1255_s23 + $0x8] sm:$0xff]  ;;  %v882_v13 = vld [vmem:[%s1255_s23] sm:$0xff]  ;;  %v920_v34 = vld [vmem:[%s1244_s9 + $0x30] sm:$0xff] }
   0xb   :  { %369 = vmatpush.bf16.msra.mxu3 %v912_v33  ;;  %v911_v35 = vld [vmem:[%s1243_s8 + $0x28] sm:$0xff]  ;;  %v910_v37 = vld [vmem:[%s1243_s8 + $0x20] sm:$0xff]  ;;  %v909_v38 = vld [vmem:[%s1243_s8 + $0x18] sm:$0xff] }
   0xc   :  { %290 = vmatpush.bf16.msra.mxu2 %v903_v19  ;;  %v919_v36 = vld [vmem:[%s1244_s9 + $0x28] sm:$0xff]  ;;  %v939_v39 = vld [vmem:[%s1240_s5] ss:$0 sm:$0xff]  ;;  %v908_v46 = vld [vmem:[%s1243_s8 + $0x10] sm:$0xff] }
   0xd   :  { %123 = vmatpush.bf16.msra.mxu0 %v888_v1  ;;  %v918_v45 = vld [vmem:[%s1244_s9 + $0x20] sm:$0xff]  ;;  %v917_v47 = vld [vmem:[%s1244_s9 + $0x18] sm:$0xff]  ;;  %v907_v48 = vld [vmem:[%s1243_s8 + $0x8] sm:$0xff] }
   0xe   :  { %208 = vmatpush.bf16.msra.mxu1 %v894_v7  ;;  %v916_v49 = vld [vmem:[%s1244_s9 + $0x10] sm:$0xff]  ;;  %v906_v50 = vld [vmem:[%s1243_s8] sm:$0xff]  ;;  %v915_v51 = vld [vmem:[%s1244_s9 + $0x8] sm:$0xff] }
   0xf   :  { %370 = vmatpush.bf16.msra.mxu3 %v911_v35  ;;  %v914_v52 = vld [vmem:[%s1244_s9] sm:$0xff]  ;;  %v929_v53 = vld [vmem:[%s1245_s11 + $0x38] sm:$0xff]  ;;  %v928_v54 = vld [vmem:[%s1245_s11 + $0x30] sm:$0xff] }
  0x10   :  { %291 = vmatpush.bf16.msra.mxu2 %v902_v20  ;;  %v927_v55 = vld [vmem:[%s1245_s11 + $0x28] sm:$0xff]  ;;  %v940_v56 = vld [vmem:[%s1242_s7] ss:$0 sm:$0xff]  ;;  %v925_v5 = vld [vmem:[%s1245_s11 + $0x18] sm:$0xff] }
  0x11   :  { %124 = vmatpush.bf16.msra.mxu0 %v887_v4  ;;  %v926_v57 = vld [vmem:[%s1245_s11 + $0x20] sm:$0xff] }
  0x12   :  { %209 = vmatpush.bf16.msra.mxu1 %v893_v9  ;;  %v53_v1 = vld [vmem:[%s1248_s1] sm:$0xf] }
  0x13   :  { %371 = vmatpush.bf16.msra.mxu3 %v910_v37  ;;  %v922_v9 = vld [vmem:[%s1245_s11] sm:$0xff] }
  0x14   :  { %292 = vmatpush.bf16.msra.mxu2 %v901_v21 }
  0x15   :  { %125 = vmatpush.bf16.msra.mxu0 %v886_v6  ;;  %v924_v6 = vld [vmem:[%s1245_s11 + $0x10] sm:$0xff] }
  0x16   :  { %210 = vmatpush.bf16.msra.mxu1 %v892_v11  ;;  %v936_v11 = vld [vmem:[%s1250_s13 + $0x30] sm:$0xff] }
  0x17   :  { %372 = vmatpush.bf16.msra.mxu3 %v909_v38 }
  0x18   :  { %293 = vmatpush.bf16.msra.mxu2 %v900_v22 }
  0x19   :  { %126 = vmatpush.bf16.msra.mxu0 %v885_v8  ;;  %v923_v8 = vld [vmem:[%s1245_s11 + $0x8] sm:$0xff] }
  0x1a   :  { %211 = vmatpush.bf16.msra.mxu1 %v891_v15 }
  0x1b   :  { %373 = vmatpush.bf16.msra.mxu3 %v908_v46 }
  0x1c   :  { %294 = vmatpush.bf16.msra.mxu2 %v899_v29  ;;  %v942_v29 = vld [vmem:[%s1249_s12] ss:$0 sm:$0xff] }
  0x1d   :  { %127 = vmatpush.bf16.msra.mxu0 %v884_v10  ;;  %v937_v10 = vld [vmem:[%s1250_s13 + $0x38] sm:$0xff] }
  0x1e   :  { %212 = vmatpush.bf16.msra.mxu1 %v890_v16  ;;  %v941_v16 = vld [vmem:[%s1246_s10] ss:$0 sm:$0xff] }
  0x1f   :  { %374 = vmatpush.bf16.msra.mxu3 %v907_v48 }
  0x20   :  { %295 = vmatpush.bf16.msra.mxu2 %v898_v30 }
  0x21   :  { %128 = vmatpush.bf16.msra.mxu0 %v883_v12  ;;  %v935_v12 = vld [vmem:[%s1250_s13 + $0x28] sm:$0xff] }
  0x22   :  { %547 = vmatpush.bf16.msrb.mxu1 %v929_v53 }
  0x23   :  { %375 = vmatpush.bf16.msra.mxu3 %v906_v50 }
  0x24   :  { %632 = vmatpush.bf16.msrb.mxu2 %v937_v10 }
  0x25   :  { %129 = vmatpush.bf16.msra.mxu0 %v882_v13  ;;  %v934_v13 = vld [vmem:[%s1250_s13 + $0x20] sm:$0xff] }
  0x26   :  { %376 = vmatmul.bf16.vlgmr.msra.gmra.mxu3 %v1076_v14  ;;  %548 = vmatpush.bf16.msrb.mxu1 %v928_v54 }
  0x28   :  { %130 = vmatmul.bf16.vlgmr.msra.gmra.mxu0 %v1076_v14  ;;  %633 = vmatpush.bf16.msrb.mxu2 %v936_v11 }
  0x29   :  { %454 = vmatpush.bf16.msrb.mxu0 %v921_v32 }
  0x2a   :  { %549 = vmatpush.bf16.msrb.mxu1 %v927_v55 }
  0x2c   :  { %634 = vmatpush.bf16.msrb.mxu2 %v935_v12 }
  0x2d   :  { %455 = vmatpush.bf16.msrb.mxu0 %v920_v34 }
  0x2e   :  { %550 = vmatpush.bf16.msrb.mxu1 %v926_v57 }
  0x30   :  { %635 = vmatpush.bf16.msrb.mxu2 %v934_v13 }
  0x31   :  { %456 = vmatpush.bf16.msrb.mxu0 %v919_v36  ;;  %v943_v36 = vld [vmem:[%s1251_s14] ss:$0 sm:$0xff] }
  0x32   :  { %551 = vmatpush.bf16.msrb.mxu1 %v925_v5 }
  0x35   :  { %457 = vmatpush.bf16.msrb.mxu0 %v918_v45 }
  0x36   :  { %552 = vmatpush.bf16.msrb.mxu1 %v924_v6 }
  0x39   :  { %458 = vmatpush.bf16.msrb.mxu0 %v917_v47 }
  0x3a   :  { %553 = vmatpush.bf16.msrb.mxu1 %v923_v8 }
  0x3d   :  { %459 = vmatpush.bf16.msrb.mxu0 %v916_v49 }
  0x3e   :  { %554 = vmatpush.bf16.msrb.mxu1 %v922_v9 }
  0x41   :  { %460 = vmatpush.bf16.msrb.mxu0 %v915_v51 }
  0x45   :  { %461 = vmatpush.bf16.msrb.mxu0 %v914_v52 }
  0xa5   :  { %v131_v24 = vpop.f32.mrf.mxu0 }
  0xa6   :  { %v132_v25 = vadd.f32 %v938_v23, %v131_v24  ;;  %v933_v24 = vld [vmem:[%s1250_s13 + $0x18] sm:$0xff] }
  0xa7   :  { %636 = vmatpush.bf16.msrb.mxu2 %v933_v24 }
  0xa8   :  { %v135_v26 = vmax.f32 %v132_v25, 0.0  ;;  %v932_v25 = vld [vmem:[%s1250_s13 + $0x10] sm:$0xff] }
  0xa9   :  { %v377_v4 = vpop.f32.mrf.mxu3 }
  0xaa   :  { %v136_v27 = vpack.c.bf16 %v135_v26, %v135_v26  ;;  %v931_v26 = vld [vmem:[%s1250_s13 + $0x8] sm:$0xff] }
  0xab   :  { %637 = vmatpush.bf16.msrb.mxu2 %v932_v25 }
  0xac   :  { %213 = vmatmul.bf16.vlgmr.msra.gmra.mxu1 %v136_v27  ;;  %v930_v27 = vld [vmem:[%s1250_s13] sm:$0xff] }
  0xad   :  { %v133_v28 = vpop.f32.mrf.mxu0 }
  0xaf   :  { %638 = vmatpush.bf16.msrb.mxu2 %v931_v26 }
  0xb1   :  { %v379_v7 = vpop.f32.mrf.mxu3 }
  0xb3   :  { %639 = vmatpush.bf16.msrb.mxu2 %v930_v27 }
 0x129   :  { %v214_v40 = vpop.f32.mrf.mxu1 }
 0x12a   :  { %v215_v41 = vadd.f32 %v939_v39, %v214_v40 }
 0x12c   :  { %v218_v42 = vmax.f32 %v215_v41, 0.0 }
 0x12e   :  { %v219_v43 = vpack.c.bf16 %v218_v42, %v218_v42 }
 0x130   :  { %296 = vmatmul.bf16.vlgmr.msra.gmra.mxu2 %v219_v43 }
 0x131   :  { %v216_v44 = vpop.f32.mrf.mxu1 }
 0x1b3   :  { %v297_v58 = vpop.f32.mrf.mxu2 }
 0x1b4   :  { %v298_v59 = vadd.f32 %v940_v56, %v297_v58 }
 0x1b6   :  { %944 = vtanh.f32 %v298_v59 }
 0x1bb   :  { %v299_v60 = vpop.f32.mrf.mxu2 }
 0x1bc   :  { %v945_v61 = vpop.eup %944 }
 0x1bd   :  { %v302_v62 = vmul.f32 2.0, %v945_v61 }
 0x1bf   :  { %303 = vst [vmem:[%s1247_s15] sm:$0xff] %v302_v62  ;;  %v381_v63 = vpack.c.bf16 %v302_v62, %v302_v62 }
 0x1c1   :  { %v383_v0 = vunpack.c.l.b16 %v381_v63 }
 0x1c3   :  { %v384_v2 = vpack.c.b16 %v383_v0, %v383_v0 }
 0x1c5   :  { %v388_v3 = vsel %vm385_vm0, %v53_v1, %v384_v2 }
 0x1c6   :  { %462 = vmatmul.bf16.vlgmr.msrb.gmra.mxu0 %v388_v3 }
 0x243   :  { %v463_v14 = vpop.f32.mrf.mxu0 }
 0x244   :  { %v468_v15 = vadd.f32 %v463_v14, %v377_v4 }
 0x246   :  { %v474_v18 = vadd.f32 %v941_v16, %v468_v15 }
 0x248   :  { %v476_v21 = vmax.f32 %v474_v18, 0.0 }
 0x24b   :  { %v465_v17 = vpop.f32.mrf.mxu0 }
 0x24c   :  { %v469_v19 = vadd.f32 %v465_v17, %v377_v4 }
 0x24e   :  { %v475_v20 = vadd.f32 %v941_v16, %v469_v19 }
 0x250   :  { %v477_v22 = vmax.f32 %v475_v20, 0.0 }
 0x252   :  { %v478_v23 = vpack.c.bf16 %v477_v22, %v476_v21 }
 0x254   :  { %555 = vmatmul.bf16.vlgmr.msrb.gmra.mxu1 %v478_v23 }
 0x2d1   :  { %v556_v28 = vpop.f32.mrf.mxu1 }
 0x2d2   :  { %v557_v30 = vadd.f32 %v942_v29, %v556_v28 }
 0x2d4   :  { %v561_v33 = vmax.f32 %v557_v30, 0.0 }
 0x2d9   :  { %v558_v31 = vpop.f32.mrf.mxu1 }
 0x2da   :  { %v559_v32 = vadd.f32 %v942_v29, %v558_v31 }
 0x2dc   :  { %v562_v34 = vmax.f32 %v559_v32, 0.0 }
 0x2de   :  { %v563_v35 = vpack.c.bf16 %v562_v34, %v561_v33 }
 0x2e0   :  { %640 = vmatmul.bf16.vlgmr.msrb.gmra.mxu2 %v563_v35 }
 0x363   :  { %v641_v37 = vpop.f32.mrf.mxu2 }
 0x364   :  { %v642_v38 = vadd.f32 %v943_v36, %v641_v37 }
 0x366   :  { %646 = vst [vmem:[%s1252_s16] sm:$0xff] %v642_v38 }
 0x36b   :  { %v643_v39 = vpop.f32.mrf.mxu2 }
 0x36c   :  { %v644_v40 = vadd.f32 %v943_v36, %v643_v39 }
 0x36e   :  { %881 = vst [vmem:[%s1252_s16 + $0x8] sm:$0xff] %v644_v40 }

</bundles_post_ra>
